<compile_context>
chip_gen: v7x
topology: tpu7x:2x2x1
jax: 0.10.0
libtpu: 0.0.40
codegen_flags: <defaults>
</compile_context>

<pallas_src>
import functools

import jax
import jax.numpy as jnp
from jax.experimental import pallas as pl
from jax.experimental.pallas import tpu as pltpu


def _round_up(n: int, m: int) -> int:
    return ((n + m - 1) // m) * m


def linear_kernel(x_ref, w_ref, b_ref, o_ref):
    # x_ref: (TB, D_in)  w_ref: (D_in, N_pad)  b_ref: (1, N)  o_ref: (TB, N)
    n = o_ref.shape[-1]
    acc = jnp.dot(x_ref[...], w_ref[...], preferred_element_type=jnp.float32)
    o_ref[...] = (acc[:, :n] + b_ref[...]).astype(o_ref.dtype)


@functools.partial(jax.jit, static_argnames=("tb",))
def classifier_forward(x, weight, bias, *, tb: int = 8192):
    """PyTorch nn.Linear semantics: out = x @ weight.T + bias.

    x:      (B, D_in) float32
    weight: (N, D_in) float32 (PyTorch layout)
    bias:   (N,)      float32
    returns (B, N)    float32
    """
    B, D_in = x.shape
    N = weight.shape[0]

    # Batch tile: multiple of 8, at most tb; for large batches cap it so the
    # parallel batch axis has >= ~4 steps (feeds both TensorCores on v7x).
    TB = min(tb, _round_up(B, 8))
    if B >= 32:
        TB = min(TB, _round_up(pl.cdiv(B, 4), 8))
    grid = pl.cdiv(B, TB)

    # Pad only the tiny resident operands (weight to lane-dense N=128); the
    # streaming x / out arrays are never padded.
    N_pad = _round_up(N, 128)
    w_p = jnp.zeros((D_in, N_pad), weight.dtype).at[:, :N].set(weight.T)
    b_p = bias.reshape(1, N)

    out = pl.pallas_call(
        linear_kernel,
        out_shape=jax.ShapeDtypeStruct((B, N), x.dtype),
        grid_spec=pltpu.PrefetchScalarGridSpec(
            num_scalar_prefetch=0,
            grid=(grid,),
            in_specs=[
                # x streams over the batch grid axis (double-buffered DMA);
                # last dim equals the full array dim (D_in) -> legal block.
                pl.BlockSpec((TB, D_in), lambda i: (i, 0)),
                # Weights / bias: constant block index -> resident in VMEM.
                pl.BlockSpec((D_in, N_pad), lambda i: (0, 0)),
                pl.BlockSpec((1, N), lambda i: (0, 0)),
            ],
            out_specs=pl.BlockSpec((TB, N), lambda i: (i, 0)),
        ),
        compiler_params=pltpu.CompilerParams(
            # Batch axis is embarrassingly parallel -> shard across TCs (v7x).
            dimension_semantics=("parallel",),
            # TB=8192 f32 x double-buffered (~6.5 MiB) + tiny out/weights fits
            # comfortably on every generation (v7x physical VMEM is 64 MiB).
            vmem_limit_bytes=32 * 1024 * 1024,
        ),
    )(x, w_p, b_p)

    return out


if __name__ == "__main__":
    D_in = 100
    N_out = 5
    B = 8

    key = jax.random.PRNGKey(0)
    kx, kw, kb = jax.random.split(key, 3)

    # Deterministic parameter init (PyTorch-style uniform bound 1/sqrt(D_in)).
    bound = 1.0 / (D_in ** 0.5)
    w = jax.random.uniform(kw, (N_out, D_in), jnp.float32, -bound, bound)
    b = jax.random.uniform(kb, (N_out,), jnp.float32, -bound, bound)
    x = jax.random.normal(kx, (B, D_in), jnp.float32)

    out = classifier_forward(x, w, b)
    out = jax.block_until_ready(out)

    # Reference check in plain JAX.
    ref = x @ w.T + b
    assert out.shape == (B, N_out)
    assert jnp.allclose(out, ref, atol=1e-5, rtol=1e-5)

    print("KERNEL_OK")
</pallas_src>

<mosaic_0001>
module attributes {stable_mosaic.version = 11 : i64} {
  func.func @linear_kernel(%arg0: i32, %arg1: memref<8x100xf32, #tpu.memory_space<vmem>>, %arg2: memref<100x128xf32, #tpu.memory_space<vmem>>, %arg3: memref<1x5xf32, #tpu.memory_space<vmem>>, %arg4: memref<8x5xf32, #tpu.memory_space<vmem>>) attributes {dimension_semantics = [#tpu.dimension_semantics<parallel>], iteration_bounds = array<i64: 1>, scalar_prefetch = 0 : i64, scratch_operands = 0 : i64, tpu.core_type = #tpu.core_type<tc>, window_params = [{transform_indices = @transform_0, window_bounds = array<i64: 8, 100>}, {pipeline_mode = #tpu.pipeline_mode<synchronous>, transform_indices = @transform_1, window_bounds = array<i64: 100, 128>}, {pipeline_mode = #tpu.pipeline_mode<synchronous>, transform_indices = @transform_2, window_bounds = array<i64: 1, 5>}, {transform_indices = @transform_3, window_bounds = array<i64: 8, 5>}]} {
    %c0 = arith.constant 0 : index
    %c0_0 = arith.constant 0 : index
    %0 = vector.load %arg1[%c0, %c0_0] : memref<8x100xf32, #tpu.memory_space<vmem>>, vector<8x100xf32>
    %c0_1 = arith.constant 0 : index
    %c0_2 = arith.constant 0 : index
    %1 = vector.load %arg2[%c0_1, %c0_2] : memref<100x128xf32, #tpu.memory_space<vmem>>, vector<100x128xf32>
    %cst = arith.constant dense<0.000000e+00> : vector<8x128xf32>
    %2 = tpu.matmul %0, %1, %cst {dimension_numbers = #tpu.dot_dimension_numbers<[1], [0], [0], [1], [0, 0, 1, 1], [], []>} : vector<8x100xf32>, vector<100x128xf32>, vector<8x128xf32> -> vector<8x128xf32>
    %3 = vector.extract_strided_slice %2 {offsets = [0, 0], sizes = [8, 5], strides = [1, 1]} : vector<8x128xf32> to vector<8x5xf32>
    %c0_3 = arith.constant 0 : index
    %c0_4 = arith.constant 0 : index
    %4 = vector.load %arg3[%c0_3, %c0_4] : memref<1x5xf32, #tpu.memory_space<vmem>>, vector<1x5xf32>
    %5 = vector.broadcast %4 : vector<1x5xf32> to vector<8x5xf32>
    %6 = arith.addf %3, %5 : vector<8x5xf32>
    %c0_5 = arith.constant 0 : index
    %c0_6 = arith.constant 0 : index
    %7 = vector.load %arg4[%c0_5, %c0_6] : memref<8x5xf32, #tpu.memory_space<vmem>>, vector<8x5xf32>
    tpu.vector_store %arg4[%c0_5, %c0_6], %6 {strides = array<i32>} : memref<8x5xf32, #tpu.memory_space<vmem>>, vector<8x5xf32>,
    return
  }
  func.func @transform_0(%arg0: i32) -> (i32, i32) {
    %c0_i32 = arith.constant 0 : i32
    %c0_i32_0 = arith.constant 0 : i32
    return %arg0, %c0_i32 : i32, i32
  }
  func.func @transform_1(%arg0: i32) -> (i32, i32) {
    %c0_i32 = arith.constant 0 : i32
    %c0_i32_0 = arith.constant 0 : i32
    %c0_i32_1 = arith.constant 0 : i32
    return %c0_i32, %c0_i32_0 : i32, i32
  }
  func.func @transform_2(%arg0: i32) -> (i32, i32) {
    %c0_i32 = arith.constant 0 : i32
    %c0_i32_0 = arith.constant 0 : i32
    %c0_i32_1 = arith.constant 0 : i32
    return %c0_i32, %c0_i32_0 : i32, i32
  }
  func.func @transform_3(%arg0: i32) -> (i32, i32) {
    %c0_i32 = arith.constant 0 : i32
    %c0_i32_0 = arith.constant 0 : i32
    return %arg0, %c0_i32 : i32, i32
  }
}

</mosaic_0001>

<bundles_post_ra>
// kernel: classifier_forward.1
= control target key start
LH: loop header
LB: loop body
LE: loop exit
PB: predicated region body
PF: predicated region fallthrough
CT: control target
= control target key end

     0   :  { %v223_v3 = vmov 0.0|0.0   ;;  %vm224_vm0 = vmmov 0   ;;  %v225_v6 = vmov 0.0   ;;  %s304_s0 = inlined_call_operand.vmem [shape: f32[8,100], index: 0, kind: input, shape index: {}]   ;;  %s305_s1 = inlined_call_operand.vmem [shape: f32[100,128], index: 1, kind: input, shape index: {}]   ;;  %s306_s2 = inlined_call_operand.vmem [shape: f32[1,5], index: 2, kind: input, shape index: {}]   ;;  %s307_s3 = inlined_call_operand.hbm [shape: f32[8,5], index: 3, kind: output, shape index: {}]  }
   0x1   :  { %v16_v0 = vld [vmem:[%s305_s1] sm:$0xff]  ;;  %v17_v1 = vld [vmem:[%s305_s1 + $0x8] sm:$0xff]  ;;  %v18_v2 = vld [vmem:[%s305_s1 + $0x10] sm:$0xff]  ;;  %177 = vmatprep.subr.bf16.mxu0 %v223_v3  ;;  %174 = vmatprep.mubr.msk.f32.mxu0 %vm224_vm0, %v225_v6 }
   0x2   :  { %v178_v4 = vpack.c.bf16 %v17_v1, %v16_v0  ;;  %v19_v5 = vld [vmem:[%s305_s1 + $0x18] sm:$0xff]  ;;  %v20_v8 = vld [vmem:[%s305_s1 + $0x20] sm:$0xff]  ;;  %v21_v9 = vld [vmem:[%s305_s1 + $0x28] sm:$0xff] }
   0x3   :  { %v181_v7 = vpack.c.bf16 %v19_v5, %v18_v2 }
   0x4   :  { %179 = vmatpush3.bf16.msra.mxu0 %v178_v4 }
   0x5   :  { %180 = vmatprep.subr.bf16.mxu0 %v223_v3 }
   0x6   :  { %8 = vsyncpa [#allocation3], 0  ;;  %v184_v10 = vpack.c.bf16 %v21_v9, %v20_v8  ;;  %v22_v11 = vld [vmem:[%s305_s1 + $0x30] sm:$0xff]  ;;  %v23_v12 = vld [vmem:[%s305_s1 + $0x38] sm:$0xff]  ;;  %vm33_vm1 = vcmask 1043456   ;;  %vm29_vm2 = vcmask 818176  }
   0x7   :  { %v187_v13 = vpack.c.bf16 %v23_v12, %v22_v11  ;;  %v24_v14 = vld [vmem:[%s305_s1 + $0x40] sm:$0xff]  ;;  %v25_v15 = vld [vmem:[%s305_s1 + $0x48] sm:$0xff]  ;;  %v26_v17 = vld [vmem:[%s305_s1 + $0x50] sm:$0xff]  ;;  %s226_s15 = smov [#allocation2]   ;;  %vm115_vm3 = vcmask 39936  }
   0x8   :  { %182 = vmatpush3.bf16.msra.mxu0 %v181_v7  ;;  %v190_v16 = vpack.c.bf16 %v25_v15, %v24_v14  ;;  %v27_v18 = vld [vmem:[%s305_s1 + $0x58] sm:$0xff]  ;;  %v28_v20 = vld [vmem:[%s305_s1 + $0x60] sm:$0xf]  ;;  %s123_s16 = sshll.u32 %s226_s15, 4  ;;  %s124_s16 = int_to_ptr.vmem [resolvable:$true] %s123_s16 }
   0x9   :  { %183 = vmatprep.subr.bf16.mxu0 %v223_v3  ;;  %v193_v19 = vpack.c.bf16 %v27_v18, %v26_v17  ;;  %v15_v21 = vld [vmem:[%s304_s0] sm:$0xff]  ;;  %s199_s1 = scalar_lea.vmem %s124_s16, 128  ;;  %p204_p1 = scmp.lt.s32.totalorder %s124_s16, %s124_s16 }
   0xa   :  { %v133_v22 = vld [vmem:[%s306_s2] ss:$0 sm:$0xff]  ;;  %p200_p0 = scmp.ne.s32.totalorder %s124_s16, %s199_s1  ;;  %p205_p2 = scmp.lt.s32.totalorder %s199_s1, %s199_s1 }
   0xc   :  { %185 = vmatpush3.bf16.msra.mxu0 %v184_v10  ;;  %p206_p3 = por %p205_p2, %p204_p1 }
   0xd   :  { %186 = vmatprep.subr.bf16.mxu0 %v223_v3 }
   0xe   :  { %p207_p4 = pnand %p206_p3, %p200_p0 }
  0x10   :  { %188 = vmatpush3.bf16.msra.mxu0 %v187_v13 }
  0x11   :  { %189 = vmatprep.subr.bf16.mxu0 %v223_v3 }
  0x14   :  { %191 = vmatpush3.bf16.msra.mxu0 %v190_v16 }
  0x15   :  { %192 = vmatprep.subr.bf16.mxu0 %v223_v3 }
  0x18   :  { %194 = vmatpush3.bf16.msra.mxu0 %v193_v19 }
  0x19   :  { %172 = vmatprep.subr.mxu0 %v225_v6 }
  0x1c   :  { %173 = vmatpush3.msk.msra.mxu0 %vm33_vm1, %v28_v20 }
  0x1d   :  { %175 = vmatmul.mubr.msk.f32.vlgmr.msra.gmra.mrb[0].mxu0 %vm29_vm2, %v15_v21 }
  0xf0   :  { %v103_v23 = vpop.f32.mrb[0].mxu0 }
  0xf1   :  { %v114_v24 = vadd.f32 %v133_v22, %v103_v23  ;;  %v176_v25 = vpop.f32.mrb[1].mxu0 }
  0xf3   :  { %116 = vst.msk [vmem:[#allocation2] sm:$0xff] %vm115_vm3, %v114_v24 }
  0xf4   :  { %210 = shalt.err (!%p207_p4)
}
  0xf5   :  { %s211_s18 = scalar_lea.hbm %s307_s3, 128 }
  0xf6   :  { %p212_p5 = scmp.ne.s32.totalorder %s307_s3, %s211_s18  ;;  %p215_p6 = scmp.lt.u32.totalorder %s211_s18, %s307_s3 }
  0xf8   :  { %p217_p7 = pnand %p215_p6, %p212_p5 }
  0xfa   :  { %220 = shalt.err (!%p217_p7)
}
  0xfb   :  { %126 = dma.vmem_to_hbm [thread:$0]  %s124_s16, 128, %s307_s3, [#allocation3]  }
  0xfc   :  { %221 = dma.done.wait [#allocation3], 128  }
  0xfd   :  { %222 = vsyncadd [#allocation3], 4294967168 }
  0xfe   :  { %130 = vsyncpa [#allocation3], 1 }

</bundles_post_ra>
